<compile_context>
chip_gen: v5e
topology: v5e:2x2
jax: 0.10.0
libtpu: 0.0.40
codegen_flags: <defaults>
</compile_context>

<pallas_src>
import functools

import jax
import jax.numpy as jnp
from jax.experimental import pallas as pl
from jax.experimental.pallas import tpu as pltpu


def _decomp_kernel(x_ref, res_ref, mean_ref, *, kernel_size: int):
    """x_ref/res_ref/mean_ref: (B_blk, C_blk, L) blocks; time on the lane axis."""
    half = (kernel_size - 1) // 2
    x = x_ref[...]
    L = x.shape[-1]
    xf = x.astype(jnp.float32)

    # Inclusive prefix sum along time (lane axis): Hillis-Steele, ceil(log2 L) steps.
    cs = xf
    offset = 1
    while offset < L:
        pad = jnp.zeros(cs.shape[:-1] + (offset,), jnp.float32)
        cs = cs + jnp.concatenate([pad, cs[..., : L - offset]], axis=-1)
        offset *= 2

    total = cs[..., L - 1 : L]  # (B_blk, C_blk, 1) running total

    # upper[t] = cs[min(t + half, L - 1)]
    if half == 0:
        upper = cs
    elif half >= L:
        upper = jnp.broadcast_to(total, cs.shape)
    else:
        upper = jnp.concatenate(
            [cs[..., half:], jnp.broadcast_to(total, cs.shape[:-1] + (half,))],
            axis=-1)

    # lower[t] = cs[t - half - 1] for t >= half + 1 else 0
    lo = half + 1
    if lo >= L:
        lower = jnp.zeros_like(cs)
    else:
        lower = jnp.concatenate(
            [jnp.zeros(cs.shape[:-1] + (lo,), jnp.float32), cs[..., : L - lo]],
            axis=-1)

    # Replicate-padding boundary corrections: windows near the edges re-weight
    # the first/last timestep instead of reading a padded temporary.
    t_idx = jax.lax.broadcasted_iota(jnp.int32, cs.shape, dimension=cs.ndim - 1)
    first = xf[..., 0:1]
    last = xf[..., L - 1 : L]
    left_corr = jnp.maximum(half - t_idx, 0).astype(jnp.float32) * first
    right_corr = jnp.maximum(t_idx - (L - 1 - half), 0).astype(jnp.float32) * last

    mean = (upper - lower + left_corr + right_corr) * (1.0 / kernel_size)
    mean_ref[...] = mean.astype(mean_ref.dtype)
    res_ref[...] = (xf - mean).astype(res_ref.dtype)


def series_decomp(x: jax.Array, kernel_size: int):
    """x: (B, L, C). Returns (res, moving_mean), both (B, L, C)."""
    if kernel_size % 2 != 1:
        raise ValueError("series_decomp requires an odd kernel_size "
                         "(replicate padding of (k-1)//2 on each side).")
    B, L, C = x.shape

    # Internal layout (B, C, L): lane-dense stores along the time axis.
    xt = jnp.transpose(x, (0, 2, 1))

    # Channel tiling (sublane axis): full C when small, else 256-channel chunks
    # (multiple of 8) so large (L, C) slabs stay inside v5e/v7x VMEM budgets.
    c_blk = C if C <= 512 else 256
    n_c = pl.cdiv(C, c_blk)

    # Batch blocking: target ~1 MiB blocks to amortize per-step overhead; keep
    # at least 2 parallel grid steps when possible (v7x has 2 TensorCores).
    itemsize = jnp.dtype(x.dtype).itemsize
    target_bytes = 1 << 20
    b_blk = max(1, min(B, target_bytes // max(1, c_blk * L * itemsize)))
    if n_c == 1 and b_blk >= B and B > 1:
        b_blk = pl.cdiv(B, 2)
    n_b = pl.cdiv(B, b_blk)

    spec = pl.BlockSpec((b_blk, c_blk, L), lambda b, c: (b, c, 0))
    out_sd = jax.ShapeDtypeStruct((B, C, L), x.dtype)
    kernel = functools.partial(_decomp_kernel, kernel_size=kernel_size)

    res_t, mean_t = pl.pallas_call(
        kernel,
        out_shape=(out_sd, out_sd),
        grid_spec=pltpu.PrefetchScalarGridSpec(
            num_scalar_prefetch=0,
            grid=(n_b, n_c),
            in_specs=[spec],
            out_specs=[spec, spec],
        ),
        compiler_params=pltpu.CompilerParams(
            dimension_semantics=("parallel", "parallel"),
            vmem_limit_bytes=32 * 1024 * 1024,
        ),
    )(xt)

    res = jnp.transpose(res_t, (0, 2, 1))
    mean = jnp.transpose(mean_t, (0, 2, 1))
    return res, mean


def _reference(x, kernel_size):
    # Pure-JAX reference mirroring the PyTorch module.
    half = (kernel_size - 1) // 2
    front = jnp.repeat(x[:, 0:1, :], half, axis=1)
    end = jnp.repeat(x[:, -1:, :], half, axis=1)
    xpad = jnp.concatenate([front, x, end], axis=1)
    L = x.shape[1]
    windows = jnp.stack([xpad[:, j:j + L, :] for j in range(kernel_size)], axis=0)
    mean = jnp.mean(windows, axis=0)
    return x - mean, mean


if __name__ == "__main__":
    key = jax.random.PRNGKey(0)
    B, L, C = 2, 16, 8
    kernel_size = 5  # odd kernel, as in Autoformer/DLinear configs

    x = jax.random.normal(key, (B, L, C), dtype=jnp.float32)

    res, mean = series_decomp(x, kernel_size)
    res, mean = jax.block_until_ready((res, mean))

    res_ref, mean_ref = _reference(x, kernel_size)
    assert jnp.allclose(mean, mean_ref, atol=1e-5, rtol=1e-5), "moving_mean mismatch"
    assert jnp.allclose(res, res_ref, atol=1e-5, rtol=1e-5), "residual mismatch"

    print("KERNEL_OK")
</pallas_src>

<mosaic_0001>
module attributes {stable_mosaic.version = 11 : i64} {
  func.func @_decomp_kernel(%arg0: i32, %arg1: i32, %arg2: memref<1x8x16xf32, #tpu.memory_space<vmem>>, %arg3: memref<1x8x16xf32, #tpu.memory_space<vmem>>, %arg4: memref<1x8x16xf32, #tpu.memory_space<vmem>>) attributes {dimension_semantics = [#tpu.dimension_semantics<parallel>, #tpu.dimension_semantics<parallel>], iteration_bounds = array<i64: 2, 1>, scalar_prefetch = 0 : i64, scratch_operands = 0 : i64, tpu.core_type = #tpu.core_type<tc>, window_params = [{transform_indices = @transform_0, window_bounds = array<i64: 1, 8, 16>}, {transform_indices = @transform_1, window_bounds = array<i64: 1, 8, 16>}, {transform_indices = @transform_2, window_bounds = array<i64: 1, 8, 16>}]} {
    %c0 = arith.constant 0 : index
    %c0_0 = arith.constant 0 : index
    %c0_1 = arith.constant 0 : index
    %0 = vector.load %arg2[%c0, %c0_0, %c0_1] : memref<1x8x16xf32, #tpu.memory_space<vmem>>, vector<1x8x16xf32>
    %cst = arith.constant 0.000000e+00 : f32
    %1 = vector.broadcast %cst : f32 to vector<1x8x1xf32>
    %2 = vector.extract_strided_slice %0 {offsets = [0, 0, 0], sizes = [1, 8, 15], strides = [1, 1, 1]} : vector<1x8x16xf32> to vector<1x8x15xf32>
    %3 = tpu.concatenate %1, %2 in 2 : vector<1x8x1xf32>, vector<1x8x15xf32> -> vector<1x8x16xf32>
    %4 = arith.addf %0, %3 : vector<1x8x16xf32>
    %cst_2 = arith.constant 0.000000e+00 : f32
    %5 = vector.broadcast %cst_2 : f32 to vector<1x8x2xf32>
    %6 = vector.extract_strided_slice %4 {offsets = [0, 0, 0], sizes = [1, 8, 14], strides = [1, 1, 1]} : vector<1x8x16xf32> to vector<1x8x14xf32>
    %7 = tpu.concatenate %5, %6 in 2 : vector<1x8x2xf32>, vector<1x8x14xf32> -> vector<1x8x16xf32>
    %8 = arith.addf %4, %7 : vector<1x8x16xf32>
    %cst_3 = arith.constant 0.000000e+00 : f32
    %9 = vector.broadcast %cst_3 : f32 to vector<1x8x4xf32>
    %10 = vector.extract_strided_slice %8 {offsets = [0, 0, 0], sizes = [1, 8, 12], strides = [1, 1, 1]} : vector<1x8x16xf32> to vector<1x8x12xf32>
    %11 = tpu.concatenate %9, %10 in 2 : vector<1x8x4xf32>, vector<1x8x12xf32> -> vector<1x8x16xf32>
    %12 = arith.addf %8, %11 : vector<1x8x16xf32>
    %cst_4 = arith.constant 0.000000e+00 : f32
    %13 = vector.broadcast %cst_4 : f32 to vector<1x8x8xf32>
    %14 = vector.extract_strided_slice %12 {offsets = [0, 0, 0], sizes = [1, 8, 8], strides = [1, 1, 1]} : vector<1x8x16xf32> to vector<1x8x8xf32>
    %15 = tpu.concatenate %13, %14 in 2 : vector<1x8x8xf32>, vector<1x8x8xf32> -> vector<1x8x16xf32>
    %16 = arith.addf %12, %15 : vector<1x8x16xf32>
    %17 = vector.extract_strided_slice %16 {offsets = [0, 0, 15], sizes = [1, 8, 1], strides = [1, 1, 1]} : vector<1x8x16xf32> to vector<1x8x1xf32>
    %18 = vector.extract_strided_slice %16 {offsets = [0, 0, 2], sizes = [1, 8, 14], strides = [1, 1, 1]} : vector<1x8x16xf32> to vector<1x8x14xf32>
    %19 = vector.shape_cast %17 : vector<1x8x1xf32> to vector<1x8x1xf32>
    %20 = vector.broadcast %19 : vector<1x8x1xf32> to vector<1x8x2xf32>
    %21 = tpu.concatenate %18, %20 in 2 : vector<1x8x14xf32>, vector<1x8x2xf32> -> vector<1x8x16xf32>
    %cst_5 = arith.constant 0.000000e+00 : f32
    %22 = vector.broadcast %cst_5 : f32 to vector<1x8x3xf32>
    %23 = vector.extract_strided_slice %16 {offsets = [0, 0, 0], sizes = [1, 8, 13], strides = [1, 1, 1]} : vector<1x8x16xf32> to vector<1x8x13xf32>
    %24 = tpu.concatenate %22, %23 in 2 : vector<1x8x3xf32>, vector<1x8x13xf32> -> vector<1x8x16xf32>
    %25 = tpu.iota {dimensions = array<i32: 2>} : vector<1x8x16xi32>
    %26 = vector.extract_strided_slice %0 {offsets = [0, 0, 0], sizes = [1, 8, 1], strides = [1, 1, 1]} : vector<1x8x16xf32> to vector<1x8x1xf32>
    %27 = vector.extract_strided_slice %0 {offsets = [0, 0, 15], sizes = [1, 8, 1], strides = [1, 1, 1]} : vector<1x8x16xf32> to vector<1x8x1xf32>
    %c2_i32 = arith.constant 2 : i32
    %28 = vector.broadcast %c2_i32 : i32 to vector<1x8x16xi32>
    %29 = arith.subi %28, %25 : vector<1x8x16xi32>
    %c0_i32 = arith.constant 0 : i32
    %30 = vector.broadcast %c0_i32 : i32 to vector<1x8x16xi32>
    %31 = arith.maxsi %29, %30 : vector<1x8x16xi32>
    %32 = arith.sitofp %31 : vector<1x8x16xi32> to vector<1x8x16xf32>
    %33 = vector.broadcast %26 : vector<1x8x1xf32> to vector<1x8x16xf32>
    %34 = arith.mulf %32, %33 : vector<1x8x16xf32>
    %c13_i32 = arith.constant 13 : i32
    %35 = vector.broadcast %c13_i32 : i32 to vector<1x8x16xi32>
    %36 = arith.subi %25, %35 : vector<1x8x16xi32>
    %c0_i32_6 = arith.constant 0 : i32
    %37 = vector.broadcast %c0_i32_6 : i32 to vector<1x8x16xi32>
    %38 = arith.maxsi %36, %37 : vector<1x8x16xi32>
    %39 = arith.sitofp %38 : vector<1x8x16xi32> to vector<1x8x16xf32>
    %40 = vector.broadcast %27 : vector<1x8x1xf32> to vector<1x8x16xf32>
    %41 = arith.mulf %39, %40 : vector<1x8x16xf32>
    %42 = arith.subf %21, %24 : vector<1x8x16xf32>
    %43 = arith.addf %42, %34 : vector<1x8x16xf32>
    %44 = arith.addf %43, %41 : vector<1x8x16xf32>
    %cst_7 = arith.constant 2.000000e-01 : f32
    %45 = vector.broadcast %cst_7 : f32 to vector<1x8x16xf32>
    %46 = arith.mulf %44, %45 : vector<1x8x16xf32>
    %c0_8 = arith.constant 0 : index
    %c0_9 = arith.constant 0 : index
    %c0_10 = arith.constant 0 : index
    %47 = vector.load %arg4[%c0_8, %c0_9, %c0_10] : memref<1x8x16xf32, #tpu.memory_space<vmem>>, vector<1x8x16xf32>
    tpu.vector_store %arg4[%c0_8, %c0_9, %c0_10], %46 {strides = array<i32>} : memref<1x8x16xf32, #tpu.memory_space<vmem>>, vector<1x8x16xf32>,
    %48 = arith.subf %0, %46 : vector<1x8x16xf32>
    %c0_11 = arith.constant 0 : index
    %c0_12 = arith.constant 0 : index
    %c0_13 = arith.constant 0 : index
    %49 = vector.load %arg3[%c0_11, %c0_12, %c0_13] : memref<1x8x16xf32, #tpu.memory_space<vmem>>, vector<1x8x16xf32>
    tpu.vector_store %arg3[%c0_11, %c0_12, %c0_13], %48 {strides = array<i32>} : memref<1x8x16xf32, #tpu.memory_space<vmem>>, vector<1x8x16xf32>,
    return
  }
  func.func @transform_0(%arg0: i32, %arg1: i32) -> (i32, i32, i32) {
    %c0_i32 = arith.constant 0 : i32
    %c0_i32_0 = arith.constant 0 : i32
    return %arg0, %arg1, %c0_i32 : i32, i32, i32
  }
  func.func @transform_1(%arg0: i32, %arg1: i32) -> (i32, i32, i32) {
    %c0_i32 = arith.constant 0 : i32
    %c0_i32_0 = arith.constant 0 : i32
    return %arg0, %arg1, %c0_i32 : i32, i32, i32
  }
  func.func @transform_2(%arg0: i32, %arg1: i32) -> (i32, i32, i32) {
    %c0_i32 = arith.constant 0 : i32
    %c0_i32_0 = arith.constant 0 : i32
    return %arg0, %arg1, %c0_i32 : i32, i32, i32
  }
}

</mosaic_0001>

<bundles_post_ra>
// kernel: tpu_custom_call.1
= control target key start
LH: loop header
LB: loop body
LE: loop exit
PB: predicated region body
PF: predicated region fallthrough
CT: control target
= control target key end

     0   :  { %8 = vsyncpa [#allocation3], 0  ;;  %s842_s0 = inlined_call_operand.hbm [shape: f32[2,8,16], index: 0, kind: input, shape index: {}]   ;;  %s843_s1 = inlined_call_operand.hbm [shape: f32[2,8,16], index: 1, kind: output, shape index: {0}]   ;;  %s844_s2 = inlined_call_operand.hbm [shape: f32[2,8,16], index: 2, kind: output, shape index: {1}]  }
   0x1   :  { %10 = vsyncpa [#allocation3 + $0x1], 0 }
   0x2   :  { %11 = vsyncpa [#allocation4], 0 }
   0x3   :  { %13 = vsyncpa [#allocation4 + $0x1], 0 }
   0x4   :  { %14 = vsyncpa [#allocation7], 0 }
   0x5   :  { %16 = vsyncpa [#allocation7 + $0x1], 0  ;;  %s682_s9 = smov 0   ;;  %s684_s10 = smov 0  }
   0x6   :  { %s686_s11 = smov 0   ;;  %s688_s12 = smov 0  }
   0x7   :  { %s690_s13 = smov 0   ;;  %s692_s14 = smov 0  }
   0x8 LB: > { %s414_s15 = sadd.s32 4294967295, %s657_s14   ;;  %s415_s16 = sadd.s32 4294967294, %s657_s14   ;;  %s657_s14 = sphi %s692_s14, %s22_s14   ;;  %s653_s13 = sphi %s690_s13, %s853_s13   ;;  %s649_s12 = sphi %s688_s12, %s852_s12   ;;  %s645_s11 = sphi %s686_s11, %s851_s11   ;;  %s641_s10 = sphi %s684_s10, %s850_s10   ;;  %s637_s9 = sphi %s682_s9, %s849_s9  }
   0x9   : > { %s34_s17 = sadd.s32 1, %s653_s13  ;;  %s43_s18 = sadd.s32 1, %s645_s11 }
   0xa   : > { %p36_p0 = scmp.ge.s32.totalorder %s34_s17, 2  ;;  %p50_p1 = scmp.ne.s32.totalorder %s645_s11, %s641_s10 }
   0xb   : > { %p51_p2 = scmp.eq.s32.totalorder %s657_s14, 0  ;;  %p56_p3 = scmp.ne.s32.totalorder %s641_s10, %s637_s9 }
   0xc   : > { %s855_s17 = smov (%p36_p0, %s34_s17), 0  ;;  %p57_p5 = scmp.eq.s32.totalorder %s414_s15, 0 }
   0xd   : > { %p723_p4 = por %p51_p2, %p50_p1  ;;  %s38_s20 = ssub.s32 %s653_s13, %s855_s17 }
   0xe   : > { %p82_p6 = scmp.eq.s32.totalorder %s414_s15, 1  ;;  %p41_p7 = scmp.eq.s32.totalorder %s38_s20, 0 }
   0xf   : > { %p729_p8 = por %p57_p5, %p56_p3  ;;  %p88_p10 = scmp.eq.s32.totalorder %s415_s16, 1 }
  0x10   : > { %p733_p9 = por %p82_p6, %p50_p1  ;;  %p417_p12 = scmp.ge.s32.totalorder %s657_s14, 2 }
  0x11   : > { %s738_s23 = scalar_select %p41_p7, %s645_s11, %s43_s18  }
  0x12   : > { %p740_p11 = por %p88_p10, %p56_p3  ;;  %p452_p13 = scmp.lt.s32.totalorder %s657_s14, 2 }
  0x13   : > { %s136_s25 = sand.u32 1, %s645_s11   ;;  %s419_s27 = sshll.u32 %s653_s13, 3 }
  0x14   : > { %s418_s26 = sshll.u32 %s136_s25, 3  ;;  %s145_s30 = scalar_lea.hbm %s842_s0, %s419_s27 }
  0x15   : > { %s140_s3 = scalar_lea.vmem [#allocation2], %s418_s26  ;;  %s147_s5 = sshll.u32 %s145_s30, 4  ;;  %s148_s5 = int_to_ptr.hbm [resolvable:$true] %s147_s5 }
  0x16   : > { %s149_s4 = sshll.u32 %s140_s3, 4  ;;  %p442_p0 = pnand %p452_p13, %p723_p4  ;;  %s150_s4 = int_to_ptr.vmem [resolvable:$true] %s149_s4 }
  0x17   : > { %p420_p1 = scmp.ge.s32.totalorder %s657_s14, 1  ;;  %p154_p2 = scmp.lt.s32.totalorder %s657_s14, 3 }
  0x18   : > { %s137_s6 = scalar_lea.sflag [#allocation3], %s136_s25 }
  0x19   : > { %444 = dma.hbm_to_vmem [thread:$0]  (!%p442_p0), %s148_s5, 128, %s150_s4, %s137_s6  }
  0x1a   : > { %p155_p3 = pnand %p420_p1, %p154_p2 }
  0x1b   : > { %s756_s7 = sand.u32 (!%p155_p3), 1, %s641_s10  }
  0x1c   : > { %158 = sbr.rel (%p155_p3) target bundleno = 646 (0x286), region = 24  ;;  %s759_s8 = sshll.u32 (!%p155_p3), %s756_s7, 3 }
  0x1d   : > { %s161_s15 = scalar_lea.sflag (!%p155_p3), [#allocation3], %s756_s7  ;;  %s164_s16 = scalar_lea.vmem (!%p155_p3), [#allocation2], %s759_s8 }
  0x21   : > { %624 = dma.done.wait (%p729_p8), %s161_s15, 128  }
  0x22   : > { %626 = vsyncadd (%p729_p8), %s161_s15, 4294967168  ;;  %v767_v0 = vld [vmem:[%s164_s16] sm:$0xff]  ;;  %s659_s18 = smov 1   ;;  %vm196_vm0 = vcmask 7168   ;;  %s660_s19 = smov 2   ;;  %vm203_vm1 = vcmask 15360   ;;  %v235_v16 = vlaneseq }
  0x23   : > { %193 = vrot.lane.b32.xlu0 %v767_v0, %s659_s18  ;;  %s661_s20 = smov 4   ;;  %vm210_vm2 = vcmask 31744   ;;  %s662_s21 = smov 8   ;;  %v663_v10 = vmov 15   ;;  %v664_v11 = vmov 0   ;;  %vm217_vm3 = vcmask 64512  }
  0x24   : > { %510 = vset.pattern.permute.xlu2 %v663_v10  ;;  %511 = vset.pattern.permute.xlu1 %v664_v11  ;;  %s665_s25 = smov 3   ;;  %s666_s26 = smov 126   ;;  %v236_v17 = vand.u32 127, %v235_v16  ;;  %vm228_vm5 = vcmask 113664   ;;  %vm233_vm7 = vcmask 23552   ;;  %vm259_vm8 = vcmask 130048  }
  0x25   : > { %512 = vset.pattern.permute.xlu0 %v663_v10  ;;  %s431_s27 = sshll.u32 %s649_s12, 3  ;;  %s190_s12 = scalar_lea.vmem [#allocation6], %s759_s8 }
  0x26   : > { %v237_v18 = vsub.s32 2, %v236_v17  ;;  %v426_v20 = vadd.s32 4294967283, %v236_v17  ;;  %s295_s30 = scalar_lea.hbm %s844_s2, %s431_s27  ;;  %s280_s5 = scalar_lea.hbm %s843_s1, %s431_s27 }
  0x27   : > { %s781_s6 = sshll.u32 %s190_s12, 4  ;;  %s299_s15 = sshll.u32 %s295_s30, 4  ;;  %s298_s6 = int_to_ptr.vmem [resolvable:$true] %s781_s6  ;;  %s300_s15 = int_to_ptr.hbm [resolvable:$true] %s299_s15 }
  0x28   : > { %v424_v21 = vcvt.s32.f32 %v237_v18  ;;  %vm238_vm4 = vcmp.gt.s32.totalorder %v237_v18, 0  ;;  %v427_v22 = vcvt.s32.f32 %v426_v20  ;;  %vm247_vm6 = vcmp.gt.s32.totalorder %v426_v20, 0  ;;  %s183_s16 = scalar_lea.vmem [#allocation5], %s759_s8  ;;  %s563_s27 = scalar_lea.hbm %s844_s2, 16 }
  0x29   : > { %s784_s18 = sshll.u32 %s183_s16, 4  ;;  %s283_s18 = int_to_ptr.vmem [resolvable:$true] %s784_s18 }
  0x2a   : > { %v425_v23 = vsel %vm238_vm4, %v424_v21, 0.0  ;;  %v428_v28 = vsel %vm247_vm6, %v427_v22, 0.0 }
  0x95   : > { %v194_v1 = vpop.permute.xlu0 %193 }
  0x96   : > { %v197_v2 = vsel %vm196_vm0, 0.0, %v194_v1 }
  0x97   : > { %v198_v3 = vadd.f32 %v197_v2, %v767_v0 }
  0x99   : > { %200 = vrot.lane.b32.xlu0 %v198_v3, %s660_s19  ;;  %s284_s19 = sshll.u32 %s280_s5, 4  ;;  %s789_s19 = int_to_ptr.hbm [resolvable:$true] %s284_s19 }
 0x10b   : > { %v201_v4 = vpop.permute.xlu0 %200 }
 0x10c   : > { %v204_v5 = vsel %vm203_vm1, 0.0, %v201_v4 }
 0x10d   : > { %v205_v6 = vadd.f32 %v204_v5, %v198_v3 }
 0x10f   : > { %207 = vrot.lane.b32.xlu1 %v205_v6, %s661_s20  ;;  %s269_s20 = scalar_lea.sflag [#allocation7], %s756_s7 }
 0x181   : > { %v208_v7 = vpop.permute.xlu1 %207 }
 0x182   : > { %v211_v8 = vsel %vm210_vm2, 0.0, %v208_v7 }
 0x183   : > { %v212_v9 = vadd.f32 %v211_v8, %v205_v6 }
 0x185   : > { %214 = vrot.lane.b32.xlu1 %v212_v9, %s662_s21  ;;  %s557_s21 = sshra.s32 %s300_s15, 4  ;;  %s558_s21 = int_to_ptr.hbm [resolvable:$true] %s557_s21 }
 0x186   : > { %s559_s8 = scalar_lea.hbm %s558_s21, 8  ;;  %p564_p7 = scmp.lt.s32.totalorder %s558_s21, %s844_s2 }
 0x187   : > { %p560_p4 = scmp.ne.s32.totalorder %s558_s21, %s559_s8  ;;  %p565_p8 = scmp.lt.s32.totalorder %s563_s27, %s559_s8 }
 0x189   : > { %p561_p5 = pnand %p560_p4, %p733_p9  ;;  %p566_p10 = por %p565_p8, %p564_p7 }
 0x18b   : > { %p562_p6 = pneg %p561_p5 }
 0x18d   : > { %242 = vperm.xlu1 %511, %v767_v0   ;;  %p567_p13 = pnand %p566_p10, %p562_p6 }
 0x1f7   : > { %v215_v12 = vpop.permute.xlu1 %214 }
 0x1f8   : > { %v218_v13 = vsel %vm217_vm3, 0.0, %v215_v12 }
 0x1f9   : > { %v219_v14 = vadd.f32 %v218_v13, %v212_v9 }
 0x1fb   : > { %230 = vrot.lane.b32.xlu0 %v219_v14, %s665_s25  ;;  %222 = vperm.xlu2 %510, %v219_v14  }
 0x1ff   : > { %v243_v24 = vpop.permute.xlu1 %242 }
 0x200   : > { %v245_v26 = vmul.f32 %v425_v23, %v243_v24 }
 0x203   : > { %225 = vrot.lane.b32.xlu2 %v219_v14, %s666_s26 }
 0x20b   : > { %251 = vperm.xlu2 %510, %v767_v0  }
 0x255   : > { %v223_v15 = vpop.permute.xlu2 %222 }
 0x25d   : > { %v226_v19 = vpop.permute.xlu2 %225 }
 0x25e   : > { %v229_v27 = vsel %vm228_vm5, %v226_v19, %v223_v15 }
 0x265   : > { %v252_v29 = vpop.permute.xlu2 %251 }
 0x266   : > { %v254_v32 = vmul.f32 %v428_v28, %v252_v29 }
 0x26d   : > { %v231_v25 = vpop.permute.xlu0 %230 }
 0x26e   : > { %v234_v30 = vsel %vm233_vm7, 0.0, %v231_v25 }
 0x26f   : > { %v255_v31 = vsub.f32 %v229_v27, %v234_v30 }
 0x271   : > { %v256_v33 = vadd.f32 %v255_v31, %v245_v26 }
 0x273   : > { %v257_v34 = vadd.f32 %v256_v33, %v254_v32 }
 0x275   : > { %v258_v35 = vmul.f32 0.2, %v257_v34 }
 0x277   : > { %v261_v36 = vsub.f32 %v767_v0, %v258_v35  ;;  %260 = vst.msk [vmem:[%s190_s12] sm:$0xff] %vm259_vm8, %v258_v35 }
 0x278   : > { %570 = shalt.err (!%p567_p13)
}
 0x279   : > { %438 = dma.vmem_to_hbm [thread:$0]  (%p733_p9), %s298_s6, 128, %s300_s15, %s269_s20   ;;  %262 = vst.msk [vmem:[%s183_s16] sm:$0xff] %vm259_vm8, %v261_v36 }
 0x27a   : > { %s264_s30 = scalar_lea.sflag [#allocation4], %s756_s7  ;;  %s585_s3 = sshra.s32 %s789_s19, 4  ;;  %s586_s3 = int_to_ptr.hbm [resolvable:$true] %s585_s3 }
 0x27b   : > { %s587_s4 = scalar_lea.hbm %s586_s3, 8  ;;  %s591_s21 = scalar_lea.hbm %s843_s1, 16 }
 0x27c   : > { %p588_p0 = scmp.ne.s32.totalorder %s586_s3, %s587_s4  ;;  %p592_p3 = scmp.lt.s32.totalorder %s586_s3, %s843_s1 }
 0x27d   : > { %p593_p4 = scmp.lt.s32.totalorder %s591_s21, %s587_s4 }
 0x27e   : > { %p589_p1 = pnand %p588_p0, %p733_p9 }
 0x27f   : > { %p594_p5 = por %p593_p4, %p592_p3 }
 0x280   : > { %p590_p2 = pneg %p589_p1 }
 0x282   : > { %p595_p6 = pnand %p594_p5, %p590_p2 }
 0x284   : > { %598 = shalt.err (!%p595_p6)
}
 0x285   : > { %437 = dma.vmem_to_hbm [thread:$0]  (%p733_p9), %s283_s18, 128, %s789_s19, %s264_s30  }
 0x286 PF: > { %s311_s7 = sand.u32 1, %s637_s9   ;;  %p446_p7 = pnand %p417_p12, %p740_p11 }
 0x287   : > { %s312_s6 = scalar_lea.sflag [#allocation4], %s311_s7 }
 0x288   : > { %p447_p8 = pneg %p446_p7 }
 0x28a   : > { %628 = dma.done.wait (%p447_p8), %s312_s6, 128  }
 0x28b   : > { %630 = vsyncadd (%p447_p8), %s312_s6, 4294967168  ;;  %s322_s15 = scalar_lea.sflag [#allocation7], %s311_s7 }
 0x28c   : > { %632 = dma.done.wait (%p447_p8), %s322_s15, 128  }
 0x28d   : > { %634 = vsyncadd (%p447_p8), %s322_s15, 4294967168  ;;  %s22_s14 = sadd.s32 1, %s657_s14   ;;  %s849_s9 = smov %s641_s10 }
 0x28e   : > { %p19_p10 = scmp.ge.s32.totalorder %s22_s14, 4   ;;  %s850_s10 = smov %s645_s11 }
 0x28f   : > { %s851_s11 = smov %s738_s23  ;;  %s852_s12 = smov %s653_s13 }
 0x290   : > { %s853_s13 = smov %s855_s17  ;;  %21 = sbr.rel (!%p19_p10) target bundleno = 8 (0x8), region = 86 }
 0x295   :  { %328 = vsyncpa [#allocation3], 1 }
 0x296   :  { %330 = vsyncpa [#allocation3 + $0x1], 1 }
 0x297   :  { %331 = vsyncpa [#allocation4], 1 }
 0x298   :  { %333 = vsyncpa [#allocation4 + $0x1], 1 }
 0x299   :  { %334 = vsyncpa [#allocation7], 1 }
 0x29a   :  { %336 = vsyncpa [#allocation7 + $0x1], 1 }

</bundles_post_ra>
